<compile_context>
chip_gen: v7x
topology: tpu7x:2x2x1
jax: 0.10.0
libtpu: 0.0.40
codegen_flags: <defaults>
</compile_context>

<pallas_src>
import functools

import jax
import jax.numpy as jnp
from jax.experimental import pallas as pl
from jax.experimental.pallas import tpu as pltpu

# Full-f32 matmuls everywhere outside the kernel (epilogue, SVD, reference) so
# the tiny 3x3 algebra does not pick up bf16 truncation noise.
jax.config.update("jax_default_matmul_precision", "highest")


def _round_up(x, m):
    return ((x + m - 1) // m) * m


# --------------------------- Pallas kernel ----------------------------------
def _procrustes_kernel(slab_ref, out_ref, anchor_sc, s0_sc, m1_sc, m2_sc, *,
                       weight_thresh):
    """slab_ref block: (TB, 8, tN) f32.
    rows 0-2 src, rows 3-5 ref, row 6 raw weights, row 7 zero pad.

    Accumulates anchored raw moments over the N tiles (k axis):
      S0  = sum(w')                  (TB,1,1)
      M1  = sum(w' * (x - anchor))   (TB,8,1)   rows 0-5 used
      M2  = sum(w' * (src-a_s)(ref-a_r)^T)   (TB,3,3)
    and writes a packed (TB,3,8) block at the last k step:
      cols 0-2 = M2, col 3 = M1_src, col 4 = M1_ref, col 5 = a_s, col 6 = a_r,
      col 7 = [S0, 0, 0].
    """
    k = pl.program_id(1)
    slab = slab_ref[...]                                      # (TB, 8, tN)

    @pl.when(k == 0)
    def _():
        # anchor = unweighted mean of the first tile (coordinate rows only);
        # any constant works exactly, a nearby one avoids cancellation.
        row_is_coord = (
            jax.lax.broadcasted_iota(jnp.int32, (1, 8, 1), 1) < 6
        ).astype(slab.dtype)
        anchor_sc[...] = jnp.mean(slab, axis=-1, keepdims=True) * row_is_coord
        s0_sc[...] = jnp.zeros_like(s0_sc)
        m1_sc[...] = jnp.zeros_like(m1_sc)
        m2_sc[...] = jnp.zeros_like(m2_sc)

    d = slab - anchor_sc[...]            # rows 0-5 anchored, row 6 = raw w
    w = d[:, 6:7, :]                                          # (TB, 1, tN)
    # threshold (zero-padded lanes/batches stay zero and contribute nothing)
    w = jnp.where(w < weight_thresh, jnp.zeros_like(w), w)

    dw = d * w                                                # (TB, 8, tN)
    s0_sc[...] += jnp.sum(w, axis=-1, keepdims=True)          # (TB, 1, 1)
    m1_sc[...] += jnp.sum(dw, axis=-1, keepdims=True)         # (TB, 8, 1)

    # 3x3 anchored cross-covariance via VPU multiplies + lane reductions
    # (exact f32; avoids MXU padding/bf16 truncation for a 3x3 result).
    ds = d[:, 0:3, :]                                         # (TB, 3, tN)
    cols = [jnp.sum(ds * dw[:, 3 + j:4 + j, :], axis=-1, keepdims=True)
            for j in range(3)]                                # 3 x (TB,3,1)
    m2_sc[...] += jnp.concatenate(cols, axis=-1)              # (TB, 3, 3)

    @pl.when(k == pl.num_programs(1) - 1)
    def _():
        anc = anchor_sc[...]                                  # (TB, 8, 1)
        m1 = m1_sc[...]                                       # (TB, 8, 1)
        s0 = s0_sc[...]                                       # (TB, 1, 1)
        s0_col = jnp.concatenate(
            [s0, jnp.zeros((s0.shape[0], 2, 1), s0.dtype)], axis=1)  # (TB,3,1)
        out_ref[...] = jnp.concatenate(
            [m2_sc[...], m1[:, 0:3, :], m1[:, 3:6, :],
             anc[:, 0:3, :], anc[:, 3:6, :], s0_col], axis=-1)       # (TB,3,8)


def _procrustes_stats(slab, *, tile_b, tile_n, weight_thresh):
    """slab: (B_pad, 8, N_pad) f32 -> packed raw moments (B_pad, 3, 8)."""
    b_pad, _, n_pad = slab.shape
    grid = (b_pad // tile_b, n_pad // tile_n)
    kernel = functools.partial(_procrustes_kernel,
                               weight_thresh=float(weight_thresh))
    return pl.pallas_call(
        kernel,
        out_shape=jax.ShapeDtypeStruct((b_pad, 3, 8), jnp.float32),
        grid_spec=pltpu.PrefetchScalarGridSpec(
            num_scalar_prefetch=0,
            grid=grid,
            in_specs=[pl.BlockSpec((tile_b, 8, tile_n), lambda b, k: (b, 0, k))],
            out_specs=pl.BlockSpec((tile_b, 3, 8), lambda b, k: (b, 0, 0)),
            scratch_shapes=[pltpu.VMEM((tile_b, 8, 1), jnp.float32),   # anchor
                            pltpu.VMEM((tile_b, 1, 1), jnp.float32),   # S0
                            pltpu.VMEM((tile_b, 8, 1), jnp.float32),   # M1
                            pltpu.VMEM((tile_b, 3, 3), jnp.float32)]),  # M2
        compiler_params=pltpu.CompilerParams(
            dimension_semantics=("parallel", "arbitrary")),
    )(slab)


# ------------------------------ wrapper --------------------------------------
def weighted_procrustes_pallas(src_points, ref_points, weights=None,
                               weight_thresh=0.5, eps=1e-5,
                               return_transform=False,
                               tile_n=None, tile_b=None):
    """JAX/Pallas equivalent of weighted_procrustes (default centroid path).

    src_points, ref_points: (B, N, 3) or (N, 3); weights: (B, N) / (N,) / None.
    Returns (R, t) or a 4x4 transform, matching the PyTorch module.
    """
    # TODO(synk): externally supplied src_centroid / ref_centroid overrides are
    # not implemented; only the default compute-from-weights path is supported.
    squeeze_first = src_points.ndim == 2
    if squeeze_first:
        src_points = src_points[None]
        ref_points = ref_points[None]
        if weights is not None:
            weights = weights[None]
    B, N, _ = src_points.shape
    if weights is None:
        weights = jnp.ones((B, N), dtype=jnp.float32)

    # --- pack src/ref/w into one channel-first slab (single XLA copy) -------
    slab = jnp.concatenate(
        [src_points.astype(jnp.float32),
         ref_points.astype(jnp.float32),
         weights.astype(jnp.float32)[..., None],
         jnp.zeros((B, N, 1), jnp.float32)], axis=-1)          # (B, N, 8)
    slab = jnp.transpose(slab, (0, 2, 1))                      # (B, 8, N)

    # --- static tiling (VMEM-safe on v5e/v6e/v7x) ---------------------------
    if tile_b is None:
        tile_b = min(8, B)
    b_pad = _round_up(B, tile_b)
    n_round = _round_up(max(N, 128), 128)
    if tile_n is None:
        tile_n = min(n_round, 8192)          # ~TB*8*tN*4*2 <= 4 MiB in flight
    tile_n = _round_up(min(tile_n, n_round), 128)
    n_pad = _round_up(n_round, tile_n)

    slab = jnp.pad(slab, ((0, b_pad - B), (0, 0), (0, n_pad - N)))

    stats = _procrustes_stats(slab, tile_b=tile_b, tile_n=tile_n,
                              weight_thresh=weight_thresh)[:B]  # (B, 3, 8)

    # --- finalize anchored raw moments (tiny per-batch algebra, plain JAX) --
    M2 = stats[:, :, 0:3]                                       # sum w' ds dr^T
    M1s = stats[:, :, 3:4]                                      # sum w' ds
    M1r = stats[:, :, 4:5]                                      # sum w' dr
    a_s = stats[:, :, 5:6]                                      # anchors
    a_r = stats[:, :, 6:7]
    S0 = stats[:, 0:1, 7:8]                                     # sum w'
    inv = 1.0 / (S0 + eps)
    c_ds = M1s * inv                                            # sum wn ds
    c_dr = M1r * inv
    s = S0 * inv                                                # sum wn
    src_c = a_s * s + c_ds                                      # (B,3,1)
    ref_c = a_r * s + c_dr
    u = a_s - src_c
    v = a_r - ref_c
    vT = jnp.swapaxes(v, -1, -2)
    c_drT = jnp.swapaxes(c_dr, -1, -2)
    H = M2 * inv + c_ds * vT + u * c_drT + s * (u * vT)         # (B,3,3)

    # --- 3x3 SVD / rotation epilogue (no Pallas SVD primitive) --------------
    # torch.svd: H = U diag(S) V^T ; jnp.linalg.svd: H = U diag(S) Vh
    U, _, Vh = jnp.linalg.svd(H)
    V = jnp.swapaxes(Vh, -1, -2)
    Ut = jnp.swapaxes(U, -1, -2)
    sign = jnp.sign(jnp.linalg.det(V @ Ut))                     # (B,)
    eye = jnp.broadcast_to(jnp.eye(3, dtype=H.dtype), (B, 3, 3))
    eye = eye.at[:, 2, 2].set(sign)
    R = V @ eye @ Ut                                            # (B,3,3)
    t = (ref_c - R @ src_c)[..., 0]                             # (B,3)

    if return_transform:
        transform = jnp.broadcast_to(jnp.eye(4, dtype=R.dtype), (B, 4, 4))
        transform = transform.at[:, :3, :3].set(R)
        transform = transform.at[:, :3, 3].set(t)
        if squeeze_first:
            transform = transform[0]
        return transform
    if squeeze_first:
        R = R[0]
        t = t[0]
    return R, t


class WeightedProcrustesPallas:
    """Mirror of the PyTorch WeightedProcrustes module (no parameters)."""

    def __init__(self, weight_thresh=0.5, eps=1e-5, return_transform=False):
        self.weight_thresh = weight_thresh
        self.eps = eps
        self.return_transform = return_transform

    def __call__(self, src_points, tgt_points, weights=None,
                 src_centroid=None, ref_centroid=None):
        if src_centroid is not None or ref_centroid is not None:
            # TODO(synk): centroid overrides not supported in the Pallas path.
            raise NotImplementedError("centroid overrides not supported")
        return weighted_procrustes_pallas(
            src_points, tgt_points, weights=weights,
            weight_thresh=self.weight_thresh, eps=self.eps,
            return_transform=self.return_transform)


# --------------------------- pure-JAX reference ------------------------------
def _reference(src_points, ref_points, weights, weight_thresh, eps):
    w = jnp.where(weights < weight_thresh, jnp.zeros_like(weights), weights)
    w = w / (jnp.sum(w, axis=1, keepdims=True) + eps)
    w = w[..., None]                                            # (B,N,1)
    src_c = jnp.sum(src_points * w, axis=1, keepdims=True)      # (B,1,3)
    ref_c = jnp.sum(ref_points * w, axis=1, keepdims=True)
    src_cen = src_points - src_c
    ref_cen = ref_points - ref_c
    H = jnp.einsum("bni,bnj->bij", src_cen, w * ref_cen,
                   precision=jax.lax.Precision.HIGHEST)
    U, _, Vh = jnp.linalg.svd(H)
    V = jnp.swapaxes(Vh, -1, -2)
    Ut = jnp.swapaxes(U, -1, -2)
    sign = jnp.sign(jnp.linalg.det(V @ Ut))
    eye = jnp.broadcast_to(jnp.eye(3), H.shape)
    eye = eye.at[:, 2, 2].set(sign)
    R = V @ eye @ Ut
    t = (jnp.swapaxes(ref_c, 1, 2) - R @ jnp.swapaxes(src_c, 1, 2))[..., 0]
    return R, t


if __name__ == "__main__":
    B, N = 3, 300
    key = jax.random.PRNGKey(0)
    k_src, k_w, k_noise = jax.random.split(key, 3)

    src = jax.random.normal(k_src, (B, N, 3), dtype=jnp.float32)
    # target cloud = rotated + translated src + small noise
    ang = jnp.array([0.3, -0.7, 1.2], dtype=jnp.float32)
    c, s = jnp.cos(ang), jnp.sin(ang)
    zero, one = jnp.zeros_like(c), jnp.ones_like(c)
    Rz = jnp.stack([jnp.stack([c, -s, zero], -1),
                    jnp.stack([s, c, zero], -1),
                    jnp.stack([zero, zero, one], -1)], -2)      # (B,3,3)
    trans = jnp.array([[0.5, -1.0, 2.0],
                       [1.5, 0.25, -0.75],
                       [-0.3, 0.8, 0.1]], jnp.float32)
    ref = jnp.einsum("bij,bnj->bni", Rz, src) + trans[:, None, :]
    ref = ref + 0.01 * jax.random.normal(k_noise, ref.shape, dtype=jnp.float32)
    weights = jax.random.uniform(k_w, (B, N), dtype=jnp.float32)

    R_ref, t_ref = _reference(src, ref, weights, 0.5, 1e-5)

    # 1) small tile_n to exercise the N-tiled accumulation path (3 k-steps,
    #    with lane padding 300 -> 384)
    R, t = weighted_procrustes_pallas(src, ref, weights, weight_thresh=0.5,
                                      eps=1e-5, tile_n=128)
    R = jax.block_until_ready(R)
    t = jax.block_until_ready(t)
    assert R.shape == (B, 3, 3) and t.shape == (B, 3)
    assert jnp.allclose(R, R_ref, atol=1e-4), (R, R_ref)
    assert jnp.allclose(t, t_ref, atol=1e-4), (t, t_ref)

    # 2) module-style call with default tiling (single N tile)
    model = WeightedProcrustesPallas(weight_thresh=0.5, eps=1e-5)
    R2, t2 = model(src, ref, weights)
    R2 = jax.block_until_ready(R2)
    assert jnp.allclose(R2, R_ref, atol=1e-4)
    assert jnp.allclose(t2, t_ref, atol=1e-4)

    # 3) unbatched (N, 3) path
    R1, t1 = model(src[0], ref[0], weights[0])
    R1 = jax.block_until_ready(R1)
    assert R1.shape == (3, 3) and t1.shape == (3,)
    assert jnp.allclose(R1, R_ref[0], atol=1e-4)
    assert jnp.allclose(t1, t_ref[0], atol=1e-4)

    print("KERNEL_OK")
</pallas_src>

<mosaic_0001>
module attributes {stable_mosaic.version = 11 : i64} {
  func.func @_procrustes_kernel(%arg0: i32, %arg1: i32, %arg2: memref<3x8x128xf32, #tpu.memory_space<vmem>>, %arg3: memref<3x3x8xf32, #tpu.memory_space<vmem>>, %arg4: memref<3x8x1xf32, #tpu.memory_space<vmem>>, %arg5: memref<3x1x1xf32, #tpu.memory_space<vmem>>, %arg6: memref<3x8x1xf32, #tpu.memory_space<vmem>>, %arg7: memref<3x3x3xf32, #tpu.memory_space<vmem>>) attributes {dimension_semantics = [#tpu.dimension_semantics<parallel>, #tpu.dimension_semantics<arbitrary>], iteration_bounds = array<i64: 1, 3>, scalar_prefetch = 0 : i64, scratch_operands = 4 : i64, tpu.core_type = #tpu.core_type<tc>, window_params = [{transform_indices = @transform_0, window_bounds = array<i64: 3, 8, 128>}, {transform_indices = @transform_1, window_bounds = array<i64: 3, 3, 8>}]} {
    %c0 = arith.constant 0 : index
    %c0_0 = arith.constant 0 : index
    %c0_1 = arith.constant 0 : index
    %0 = vector.load %arg2[%c0, %c0_0, %c0_1] : memref<3x8x128xf32, #tpu.memory_space<vmem>>, vector<3x8x128xf32>
    %c0_i32 = arith.constant 0 : i32
    %1 = arith.cmpi eq, %arg1, %c0_i32 : i32
    %2 = arith.extui %1 : i1 to i32
    %c0_i32_2 = arith.constant 0 : i32
    %3 = arith.cmpi ne, %2, %c0_i32_2 : i32
    scf.if %3 {
      %47 = tpu.iota {dimensions = array<i32: 1>} : vector<1x8x1xi32>
      %c6_i32 = arith.constant 6 : i32
      %48 = vector.broadcast %c6_i32 : i32 to vector<1x8x1xi32>
      %49 = arith.cmpi slt, %47, %48 : vector<1x8x1xi32>
      %50 = arith.extui %49 : vector<1x8x1xi1> to vector<1x8x1xi32>
      %51 = arith.sitofp %50 : vector<1x8x1xi32> to vector<1x8x1xf32>
      %cst_31 = arith.constant dense<0.000000e+00> : vector<3x8xf32>
      %52 = vector.multi_reduction <add>, %0, %cst_31 [2] : vector<3x8x128xf32> to vector<3x8xf32>
      %53 = vector.shape_cast %52 : vector<3x8xf32> to vector<3x8x1xf32>
      %cst_32 = arith.constant 1.280000e+02 : f32
      %54 = vector.broadcast %cst_32 : f32 to vector<3x8x1xf32>
      %55 = arith.divf %53, %54 : vector<3x8x1xf32>
      %56 = vector.broadcast %51 : vector<1x8x1xf32> to vector<3x8x1xf32>
      %57 = arith.mulf %55, %56 : vector<3x8x1xf32>
      %c0_33 = arith.constant 0 : index
      %c0_34 = arith.constant 0 : index
      %c0_35 = arith.constant 0 : index
      %58 = vector.load %arg4[%c0_33, %c0_34, %c0_35] : memref<3x8x1xf32, #tpu.memory_space<vmem>>, vector<3x8x1xf32>
      tpu.vector_store %arg4[%c0_33, %c0_34, %c0_35], %57 {strides = array<i32>} : memref<3x8x1xf32, #tpu.memory_space<vmem>>, vector<3x8x1xf32>,
      %cst_36 = arith.constant 0.000000e+00 : f32
      %59 = vector.broadcast %cst_36 : f32 to vector<3x1x1xf32>
      %c0_37 = arith.constant 0 : index
      %c0_38 = arith.constant 0 : index
      %c0_39 = arith.constant 0 : index
      %60 = vector.load %arg5[%c0_37, %c0_38, %c0_39] : memref<3x1x1xf32, #tpu.memory_space<vmem>>, vector<3x1x1xf32>
      tpu.vector_store %arg5[%c0_37, %c0_38, %c0_39], %59 {strides = array<i32>} : memref<3x1x1xf32, #tpu.memory_space<vmem>>, vector<3x1x1xf32>,
      %cst_40 = arith.constant 0.000000e+00 : f32
      %61 = vector.broadcast %cst_40 : f32 to vector<3x8x1xf32>
      %c0_41 = arith.constant 0 : index
      %c0_42 = arith.constant 0 : index
      %c0_43 = arith.constant 0 : index
      %62 = vector.load %arg6[%c0_41, %c0_42, %c0_43] : memref<3x8x1xf32, #tpu.memory_space<vmem>>, vector<3x8x1xf32>
      tpu.vector_store %arg6[%c0_41, %c0_42, %c0_43], %61 {strides = array<i32>} : memref<3x8x1xf32, #tpu.memory_space<vmem>>, vector<3x8x1xf32>,
      %cst_44 = arith.constant 0.000000e+00 : f32
      %63 = vector.broadcast %cst_44 : f32 to vector<3x3x3xf32>
      %c0_45 = arith.constant 0 : index
      %c0_46 = arith.constant 0 : index
      %c0_47 = arith.constant 0 : index
      %64 = vector.load %arg7[%c0_45, %c0_46, %c0_47] : memref<3x3x3xf32, #tpu.memory_space<vmem>>, vector<3x3x3xf32>
      tpu.vector_store %arg7[%c0_45, %c0_46, %c0_47], %63 {strides = array<i32>} : memref<3x3x3xf32, #tpu.memory_space<vmem>>, vector<3x3x3xf32>,
    } else {
    }
    %c0_3 = arith.constant 0 : index
    %c0_4 = arith.constant 0 : index
    %c0_5 = arith.constant 0 : index
    %4 = vector.load %arg4[%c0_3, %c0_4, %c0_5] : memref<3x8x1xf32, #tpu.memory_space<vmem>>, vector<3x8x1xf32>
    %5 = vector.broadcast %4 : vector<3x8x1xf32> to vector<3x8x128xf32>
    %6 = arith.subf %0, %5 : vector<3x8x128xf32>
    %7 = vector.extract_strided_slice %6 {offsets = [0, 6, 0], sizes = [3, 1, 128], strides = [1, 1, 1]} : vector<3x8x128xf32> to vector<3x1x128xf32>
    %cst = arith.constant 5.000000e-01 : f32
    %8 = vector.broadcast %cst : f32 to vector<3x1x128xf32>
    %9 = arith.cmpf olt, %7, %8 : vector<3x1x128xf32>
    %cst_6 = arith.constant 0.000000e+00 : f32
    %10 = vector.broadcast %cst_6 : f32 to vector<3x1x128xf32>
    %11 = arith.select %9, %10, %7 : vector<3x1x128xi1>, vector<3x1x128xf32>
    %12 = vector.broadcast %11 : vector<3x1x128xf32> to vector<3x8x128xf32>
    %13 = arith.mulf %6, %12 : vector<3x8x128xf32>
    %c0_7 = arith.constant 0 : index
    %c0_8 = arith.constant 0 : index
    %c0_9 = arith.constant 0 : index
    %14 = vector.load %arg5[%c0_7, %c0_8, %c0_9] : memref<3x1x1xf32, #tpu.memory_space<vmem>>, vector<3x1x1xf32>
    %cst_10 = arith.constant dense<0.000000e+00> : vector<3x1xf32>
    %15 = vector.multi_reduction <add>, %11, %cst_10 [2] : vector<3x1x128xf32> to vector<3x1xf32>
    %16 = vector.shape_cast %15 : vector<3x1xf32> to vector<3x1x1xf32>
    %17 = arith.addf %14, %16 : vector<3x1x1xf32>
    %c0_11 = arith.constant 0 : index
    %c0_12 = arith.constant 0 : index
    %c0_13 = arith.constant 0 : index
    %18 = vector.load %arg5[%c0_11, %c0_12, %c0_13] : memref<3x1x1xf32, #tpu.memory_space<vmem>>, vector<3x1x1xf32>
    tpu.vector_store %arg5[%c0_11, %c0_12, %c0_13], %17 {strides = array<i32>} : memref<3x1x1xf32, #tpu.memory_space<vmem>>, vector<3x1x1xf32>,
    %c0_14 = arith.constant 0 : index
    %c0_15 = arith.constant 0 : index
    %c0_16 = arith.constant 0 : index
    %19 = vector.load %arg6[%c0_14, %c0_15, %c0_16] : memref<3x8x1xf32, #tpu.memory_space<vmem>>, vector<3x8x1xf32>
    %cst_17 = arith.constant dense<0.000000e+00> : vector<3x8xf32>
    %20 = vector.multi_reduction <add>, %13, %cst_17 [2] : vector<3x8x128xf32> to vector<3x8xf32>
    %21 = vector.shape_cast %20 : vector<3x8xf32> to vector<3x8x1xf32>
    %22 = arith.addf %19, %21 : vector<3x8x1xf32>
    %c0_18 = arith.constant 0 : index
    %c0_19 = arith.constant 0 : index
    %c0_20 = arith.constant 0 : index
    %23 = vector.load %arg6[%c0_18, %c0_19, %c0_20] : memref<3x8x1xf32, #tpu.memory_space<vmem>>, vector<3x8x1xf32>
    tpu.vector_store %arg6[%c0_18, %c0_19, %c0_20], %22 {strides = array<i32>} : memref<3x8x1xf32, #tpu.memory_space<vmem>>, vector<3x8x1xf32>,
    %24 = vector.extract_strided_slice %6 {offsets = [0, 0, 0], sizes = [3, 3, 128], strides = [1, 1, 1]} : vector<3x8x128xf32> to vector<3x3x128xf32>
    %25 = vector.extract_strided_slice %13 {offsets = [0, 3, 0], sizes = [3, 1, 128], strides = [1, 1, 1]} : vector<3x8x128xf32> to vector<3x1x128xf32>
    %26 = vector.broadcast %25 : vector<3x1x128xf32> to vector<3x3x128xf32>
    %27 = arith.mulf %24, %26 : vector<3x3x128xf32>
    %cst_21 = arith.constant dense<0.000000e+00> : vector<3x3xf32>
    %28 = vector.multi_reduction <add>, %27, %cst_21 [2] : vector<3x3x128xf32> to vector<3x3xf32>
    %29 = vector.shape_cast %28 : vector<3x3xf32> to vector<3x3x1xf32>
    %30 = vector.extract_strided_slice %13 {offsets = [0, 4, 0], sizes = [3, 1, 128], strides = [1, 1, 1]} : vector<3x8x128xf32> to vector<3x1x128xf32>
    %31 = vector.broadcast %30 : vector<3x1x128xf32> to vector<3x3x128xf32>
    %32 = arith.mulf %24, %31 : vector<3x3x128xf32>
    %cst_22 = arith.constant dense<0.000000e+00> : vector<3x3xf32>
    %33 = vector.multi_reduction <add>, %32, %cst_22 [2] : vector<3x3x128xf32> to vector<3x3xf32>
    %34 = vector.shape_cast %33 : vector<3x3xf32> to vector<3x3x1xf32>
    %35 = vector.extract_strided_slice %13 {offsets = [0, 5, 0], sizes = [3, 1, 128], strides = [1, 1, 1]} : vector<3x8x128xf32> to vector<3x1x128xf32>
    %36 = vector.broadcast %35 : vector<3x1x128xf32> to vector<3x3x128xf32>
    %37 = arith.mulf %24, %36 : vector<3x3x128xf32>
    %cst_23 = arith.constant dense<0.000000e+00> : vector<3x3xf32>
    %38 = vector.multi_reduction <add>, %37, %cst_23 [2] : vector<3x3x128xf32> to vector<3x3xf32>
    %39 = vector.shape_cast %38 : vector<3x3xf32> to vector<3x3x1xf32>
    %c0_24 = arith.constant 0 : index
    %c0_25 = arith.constant 0 : index
    %c0_26 = arith.constant 0 : index
    %40 = vector.load %arg7[%c0_24, %c0_25, %c0_26] : memref<3x3x3xf32, #tpu.memory_space<vmem>>, vector<3x3x3xf32>
    %41 = tpu.concatenate %29, %34, %39 in 2 : vector<3x3x1xf32>, vector<3x3x1xf32>, vector<3x3x1xf32> -> vector<3x3x3xf32>
    %42 = arith.addf %40, %41 : vector<3x3x3xf32>
    %c0_27 = arith.constant 0 : index
    %c0_28 = arith.constant 0 : index
    %c0_29 = arith.constant 0 : index
    %43 = vector.load %arg7[%c0_27, %c0_28, %c0_29] : memref<3x3x3xf32, #tpu.memory_space<vmem>>, vector<3x3x3xf32>
    tpu.vector_store %arg7[%c0_27, %c0_28, %c0_29], %42 {strides = array<i32>} : memref<3x3x3xf32, #tpu.memory_space<vmem>>, vector<3x3x3xf32>,
    %c2_i32 = arith.constant 2 : i32
    %44 = arith.cmpi eq, %arg1, %c2_i32 : i32
    %45 = arith.extui %44 : i1 to i32
    %c0_i32_30 = arith.constant 0 : i32
    %46 = arith.cmpi ne, %45, %c0_i32_30 : i32
    scf.if %46 {
      %c0_31 = arith.constant 0 : index
      %c0_32 = arith.constant 0 : index
      %c0_33 = arith.constant 0 : index
      %47 = vector.load %arg4[%c0_31, %c0_32, %c0_33] : memref<3x8x1xf32, #tpu.memory_space<vmem>>, vector<3x8x1xf32>
      %c0_34 = arith.constant 0 : index
      %c0_35 = arith.constant 0 : index
      %c0_36 = arith.constant 0 : index
      %48 = vector.load %arg6[%c0_34, %c0_35, %c0_36] : memref<3x8x1xf32, #tpu.memory_space<vmem>>, vector<3x8x1xf32>
      %c0_37 = arith.constant 0 : index
      %c0_38 = arith.constant 0 : index
      %c0_39 = arith.constant 0 : index
      %49 = vector.load %arg5[%c0_37, %c0_38, %c0_39] : memref<3x1x1xf32, #tpu.memory_space<vmem>>, vector<3x1x1xf32>
      %cst_40 = arith.constant 0.000000e+00 : f32
      %50 = vector.broadcast %cst_40 : f32 to vector<3x2x1xf32>
      %51 = tpu.concatenate %49, %50 in 1 : vector<3x1x1xf32>, vector<3x2x1xf32> -> vector<3x3x1xf32>
      %c0_41 = arith.constant 0 : index
      %c0_42 = arith.constant 0 : index
      %c0_43 = arith.constant 0 : index
      %52 = vector.load %arg7[%c0_41, %c0_42, %c0_43] : memref<3x3x3xf32, #tpu.memory_space<vmem>>, vector<3x3x3xf32>
      %53 = vector.extract_strided_slice %48 {offsets = [0, 0, 0], sizes = [3, 3, 1], strides = [1, 1, 1]} : vector<3x8x1xf32> to vector<3x3x1xf32>
      %54 = vector.extract_strided_slice %48 {offsets = [0, 3, 0], sizes = [3, 3, 1], strides = [1, 1, 1]} : vector<3x8x1xf32> to vector<3x3x1xf32>
      %55 = vector.extract_strided_slice %47 {offsets = [0, 0, 0], sizes = [3, 3, 1], strides = [1, 1, 1]} : vector<3x8x1xf32> to vector<3x3x1xf32>
      %56 = vector.extract_strided_slice %47 {offsets = [0, 3, 0], sizes = [3, 3, 1], strides = [1, 1, 1]} : vector<3x8x1xf32> to vector<3x3x1xf32>
      %57 = tpu.concatenate %52, %53, %54, %55, %56, %51 in 2 : vector<3x3x3xf32>, vector<3x3x1xf32>, vector<3x3x1xf32>, vector<3x3x1xf32>, vector<3x3x1xf32>, vector<3x3x1xf32> -> vector<3x3x8xf32>
      %c0_44 = arith.constant 0 : index
      %c0_45 = arith.constant 0 : index
      %c0_46 = arith.constant 0 : index
      %58 = vector.load %arg3[%c0_44, %c0_45, %c0_46] : memref<3x3x8xf32, #tpu.memory_space<vmem>>, vector<3x3x8xf32>
      tpu.vector_store %arg3[%c0_44, %c0_45, %c0_46], %57 {strides = array<i32>} : memref<3x3x8xf32, #tpu.memory_space<vmem>>, vector<3x3x8xf32>,
    } else {
    }
    return
  }
  func.func @transform_0(%arg0: i32, %arg1: i32) -> (i32, i32, i32) {
    %c0_i32 = arith.constant 0 : i32
    %c0_i32_0 = arith.constant 0 : i32
    return %arg0, %c0_i32, %arg1 : i32, i32, i32
  }
  func.func @transform_1(%arg0: i32, %arg1: i32) -> (i32, i32, i32) {
    %c0_i32 = arith.constant 0 : i32
    %c0_i32_0 = arith.constant 0 : i32
    %c0_i32_1 = arith.constant 0 : i32
    return %arg0, %c0_i32, %c0_i32_0 : i32, i32, i32
  }
}

</mosaic_0001>

<bundles_post_ra>
// kernel: tpu_custom_call.1
= control target key start
LH: loop header
LB: loop body
LE: loop exit
PB: predicated region body
PF: predicated region fallthrough
CT: control target
= control target key end

     0   :  { %6 = vsyncpa [#allocation7], 0  ;;  %s980_s0 = inlined_call_operand.hbm [shape: f32[3,8,384], index: 0, kind: input, shape index: {}]   ;;  %s981_s1 = inlined_call_operand.hbm [shape: f32[3,3,8], index: 1, kind: output, shape index: {}]  }
   0x1   :  { %8 = vsyncpa [#allocation7 + $0x1], 0 }
   0x2   :  { %9 = vsyncpa [#allocation8], 0  ;;  %s777_s6 = smov 0   ;;  %s779_s7 = smov 0  }
   0x3   :  { %s781_s8 = smov 0   ;;  %s783_s9 = smov 0  }
   0x4   :  { %s785_s10 = smov 0   ;;  %s787_s11 = smov 0  }
   0x5 LB: > { %s551_s12 = sadd.s32 4294967295, %s751_s11   ;;  %s24_s13 = sadd.s32 1, %s747_s10  ;;  %s751_s11 = sphi %s787_s11, %s15_s11   ;;  %s747_s10 = sphi %s785_s10, %s990_s10   ;;  %s743_s9 = sphi %s783_s9, %s989_s9   ;;  %s739_s8 = sphi %s781_s8, %s988_s8   ;;  %s735_s7 = sphi %s779_s7, %s987_s7   ;;  %s731_s6 = sphi %s777_s6, %s986_s6  }
   0x6   : > { %p25_p0 = scmp.ge.s32.totalorder %s24_s13, 3  ;;  %s36_s14 = sadd.s32 1, %s739_s8 }
   0x7   : > { %p43_p1 = scmp.ne.s32.totalorder %s739_s8, %s735_s7  ;;  %p44_p2 = scmp.eq.s32.totalorder %s751_s11, 0 }
   0x8   : > { %s992_s13 = smov (%p25_p0, %s24_s13), 0  ;;  %p49_p4 = scmp.ne.s32.totalorder %s735_s7, %s731_s6 }
   0x9   : > { %p45_p3 = por %p44_p2, %p43_p1  ;;  %s32_s15 = ssub.s32 %s747_s10, %s992_s13 }
   0xa   : > { %p50_p5 = scmp.eq.s32.totalorder %s551_s12, 0  ;;  %p34_p6 = scmp.eq.s32.totalorder %s32_s15, 0 }
   0xb   : > { %p575_p8 = scmp.lt.s32.totalorder %s751_s11, 3  ;;  %s99_s18 = sand.u32 1, %s739_s8  }
   0xc   : > { %p818_p7 = por %p50_p5, %p49_p4  ;;  %s554_s19 = sshll.u32 %s747_s10, 7 }
   0xd   : > { %s824_s17 = scalar_select %p34_p6, %s739_s8, %s36_s14  }
   0xe   : > { %s563_s20 = smul.u32 24, %s99_s18  ;;  %s831_s23 = scalar_lea.hbm %s980_s0, %s554_s19 }
   0xf   : > { %p833_p9 = pnand %p575_p8, %p45_p3  ;;  %s840_s27 = scalar_lea.sflag [#allocation7], %s99_s18 }
  0x10   : > { %s103_s25 = scalar_lea.vmem [#allocation6], %s563_s20  ;;  %s641_s28 = scalar_lea.hbm %s831_s23, 384 }
  0x11   : > { %s112_s26 = sshll.u32 %s103_s25, 4  ;;  %p642_p11 = scmp.ne.s32.totalorder %s831_s23, %s641_s28  ;;  %s837_s26 = int_to_ptr.vmem [resolvable:$true] %s112_s26 }
  0x12   : > { %p643_p12 = pneg %p833_p9  ;;  %s646_s2 = scalar_lea.hbm %s980_s0, 1152 }
  0x13   : > { %p647_p1 = scmp.lt.u32.totalorder %s831_s23, %s980_s0  ;;  %p648_p2 = scmp.lt.u32.totalorder %s646_s2, %s641_s28 }
  0x14   : > { %p644_p13 = pnand %p643_p12, %p642_p11  ;;  %p650_p4 = scmp.lt.u32.totalorder %s641_s28, %s831_s23 }
  0x15   : > { %p649_p3 = por %p648_p2, %p647_p1 }
  0x16   : > { %p645_p0 = pneg %p644_p13 }
  0x17   : > { %p651_p5 = por %p650_p4, %p649_p3 }
  0x19   : > { %p652_p6 = pnand %p651_p5, %p645_p0 }
  0x1b   : > { %655 = shalt.err (!%p652_p6)
}
  0x1c   : > { %s656_s5 = scalar_lea.vmem %s837_s26, 384  ;;  %s753_s6 = smov [#allocation6]  }
  0x1d   : > { %p657_p8 = scmp.ne.s32.totalorder %s837_s26, %s656_s5  ;;  %s661_s14 = sshll.u32 %s753_s6, 4  ;;  %s662_s14 = int_to_ptr.vmem [resolvable:$false] %s661_s14 }
  0x1e   : > { %s663_s15 = scalar_lea.vmem %s662_s14, 768  ;;  %p664_p10 = scmp.lt.s32.totalorder %s837_s26, %s662_s14 }
  0x1f   : > { %p659_p11 = pnand %p657_p8, %p643_p12  ;;  %p665_p1 = scmp.lt.s32.totalorder %s663_s15, %s656_s5 }
  0x21   : > { %p660_p13 = pneg %p659_p11  ;;  %p666_p2 = por %p665_p1, %p664_p10 }
  0x23   : > { %p667_p3 = pnand %p666_p2, %p660_p13 }
  0x25   : > { %670 = shalt.err (!%p667_p3)
}
  0x26   : > { %s754_s18 = smov 384   ;;  %s755_s19 = smov 128  }
  0x27   : > { %s756_s20 = smov 8   ;;  %p120_p12 = scmp.lt.s32.totalorder %s751_s11, 4 }
  0x28   : > { %574 = dma.hbm_to_vmem [thread:$0]  (!%p833_p9), %s831_s23, 384, %s837_s26, %s840_s27, %s754_s18, %s755_s19, %s756_s20  }
  0x29   : > { %p984_p0 = scmp.ge.s32.totalorder %s751_s11, 1 }
  0x2b   : > { %p121_p4 = pnand %p984_p0, %p120_p12 }
  0x2c   : > { %s126_s21 = sand.u32 (!%p121_p4), 1, %s735_s7  }
  0x2d   : > { %124 = sbr.rel (%p121_p4) target bundleno = 692 (0x2b4), region = 24  ;;  %s127_s25 = scalar_lea.sflag (!%p121_p4), [#allocation7], %s126_s21 }
  0x2e   : > { %s564_s22 = smul.u32 (!%p121_p4), 24, %s126_s21 }
  0x30   : > { %s130_s28 = scalar_lea.vmem (!%p121_p4), [#allocation6], %s564_s22 }
  0x34   : > { %722 = dma.done.wait (%p818_p7), %s127_s25, 384  }
  0x35   : > { %724 = vsyncadd (%p818_p7), %s127_s25, 4294966912  ;;  %v146_v0 = vld [vmem:[%s130_s28] sm:$0xff]  ;;  %v147_v1 = vld [vmem:[%s130_s28 + $0x8] sm:$0xff]  ;;  %p556_p9 = scmp.ne.s32.totalorder %s743_s9, 0 }
  0x36   : > { %v148_v2 = vld [vmem:[%s130_s28 + $0x10] sm:$0xff]  ;;  %158 = vadd.xlane.f32.xlu0 (!%p556_p9), %v146_v0  ;;  %vm171_vm0 = vcmask (!%p556_p9), 7168   ;;  %v757_v3 = vmov (!%p556_p9), 0.0   ;;  %vm175_vm1 = vcmask (!%p556_p9), 0   ;;  %vm182_vm2 = vcmask (!%p556_p9), 18432  }
  0x37   : > { %152 = sbr.rel (%p556_p9) target bundleno = 205 (0xcd), region = 32  ;;  %162 = vadd.xlane.f32.xlu1 (!%p556_p9), %v148_v2  ;;  %179 = vst.msk [vmem:[#allocation4] sm:$0xff] (!%p556_p9), %vm171_vm0, %v757_v3  ;;  %180 = vst.msk [vmem:[#allocation4 + $0x8] sm:$0xff] (!%p556_p9), %vm171_vm0, %v757_v3  ;;  %v153_v4 = vlaneseq (!%p556_p9) }
  0x38   : > { %181 = vst.msk [vmem:[#allocation4 + $0x10] sm:$0xff] (!%p556_p9), %vm171_vm0, %v757_v3 }
  0x39   : > { %176 = vst.msk [vmem:[#allocation3] sm:$0x1] (!%p556_p9), %vm175_vm1, %v757_v3  ;;  %177 = vst.msk [vmem:[#allocation3 + $0x1] sm:$0x1] (!%p556_p9), %vm175_vm1, %v757_v3  ;;  %v154_v5 = vshrl.u32 (!%p556_p9), %v153_v4, 7 }
  0x3a   : > { %160 = vadd.xlane.f32.xlu0 (!%p556_p9), %v147_v1  ;;  %178 = vst.msk [vmem:[#allocation3 + $0x2] sm:$0x1] (!%p556_p9), %vm175_vm1, %v757_v3 }
  0x3b   : > { %183 = vst.msk [vmem:[#allocation5] sm:$0x7] (!%p556_p9), %vm182_vm2, %v757_v3  ;;  %184 = vst.msk [vmem:[#allocation5 + $0x4] sm:$0x7] (!%p556_p9), %vm182_vm2, %v757_v3  ;;  %vm155_vm3 = vcmp.lt.s32.totalorder (!%p556_p9), %v154_v5, 6 }
  0x3c   : > { %185 = vst.msk [vmem:[#allocation5 + $0x8] sm:$0x7] (!%p556_p9), %vm182_vm2, %v757_v3  ;;  %v557_v7 = vsel (!%p556_p9), %vm155_vm3, 1.0, %v757_v3 }
  0xc3   : > { %v159_v6 = vpop.xlane.xlu0 %158 }
  0xc4   : > { %v163_v8 = vpop.xlane.xlu1 %162  ;;  %v165_v9 = vmul.f32 0.0078125, %v159_v6 }
  0xc5   : > { %v167_v10 = vmul.f32 0.0078125, %v163_v8 }
  0xc6   : > { %v168_v11 = vmul.f32 %v557_v7, %v165_v9 }
  0xc7   : > { %v170_v12 = vmul.f32 %v557_v7, %v167_v10  ;;  %v161_v13 = vpop.xlane.xlu0 %160 }
  0xc8   : > { %172 = vst.msk [vmem:[#allocation2] sm:$0xff] %vm171_vm0, %v168_v11  ;;  %v166_v14 = vmul.f32 0.0078125, %v161_v13 }
  0xc9   : > { %174 = vst.msk [vmem:[#allocation2 + $0x10] sm:$0xff] %vm171_vm0, %v170_v12 }
  0xca   : > { %v169_v15 = vmul.f32 %v557_v7, %v166_v14 }
  0xcc   : > { %173 = vst.msk [vmem:[#allocation2 + $0x8] sm:$0xff] %vm171_vm0, %v169_v15 }
  0xcd PF: > { %v758_v18 = vmov 0   ;;  %v213_v20 = vlaneseq  ;;  %vm231_vm4 = vcmask 1046534   ;;  %vm297_vm8 = vcmask 1042432   ;;  %p558_p7 = scmp.ne.s32.totalorder %s743_s9, 2 }
  0xce   : > { %640 = vset.pattern.permute.xlu1 %v758_v18  ;;  %639 = vset.pattern.permute.xlu0 %v758_v18  ;;  %vm262_vm9 = vcmask 0   ;;  %vm278_vm10 = vcmask 7168   ;;  %vm361_vm11 = vcmask 15360   ;;  %vm368_vm12 = vcmask 18432   ;;  %s759_s16 = smov (!%p558_p7), 3   ;;  %s760_s23 = smov (!%p558_p7), 4  }
  0xcf   : > { %v186_v17 = vld [vmem:[#allocation2] sm:$0xff]  ;;  %v214_v21 = vshrl.u32 %v213_v20, 7  ;;  %v228_v7 = vld [vmem:[#allocation3] sm:$0x1]  ;;  %v229_v11 = vld [vmem:[#allocation3 + $0x1] sm:$0x1] }
  0xd0   : > { %v188_v16 = vld [vmem:[#allocation2 + $0x10] sm:$0xff]  ;;  %191 = vperm.xlu0 %639, %v186_v17   ;;  %s761_s24 = smov (!%p558_p7), 5   ;;  %s762_s9 = smov (!%p558_p7), 6   ;;  %vm385_vm13 = vcmask (!%p558_p7), 1040384   ;;  %vm452_vm14 = vcmask (!%p558_p7), 23552   ;;  %vm456_vm15 = vcmask (!%p558_p7), 31744  }
  0xd1   : > { %201 = vperm.xlu1 %640, %v188_v16   ;;  %v883_v26 = vsub.s32 6, %v214_v21  ;;  %v284_v29 = vsub.s32 3, %v214_v21  ;;  %v309_v45 = vsub.s32 4, %v214_v21  ;;  %v333_v46 = vsub.s32 5, %v214_v21  ;;  %v230_v16 = vld [vmem:[#allocation3 + $0x2] sm:$0x1] }
  0xd2   : > { %s763_s26 = smov (!%p558_p7), 7   ;;  %vm460_vm0 = vcmask (!%p558_p7), 39936   ;;  %vm464_vm1 = vcmask (!%p558_p7), 48128   ;;  %vm468_vm2 = vcmask (!%p558_p7), 56320   ;;  %vm472_vm3 = vcmask (!%p558_p7), 59392  }
  0xd3   : > { %v187_v19 = vld [vmem:[#allocation2 + $0x8] sm:$0xff] }
  0xd4   : > { %196 = vperm.xlu0 %639, %v187_v19   ;;  %v266_v19 = vld [vmem:[#allocation4] sm:$0xff] }
 0x14f   : > { %v192_v23 = vpop.permute.xlu0 %191 }
 0x150   : > { %v202_v22 = vpop.permute.xlu1 %201  ;;  %v204_v25 = vsub.f32 %v146_v0, %v192_v23 }
 0x151   : > { %v206_v24 = vsub.f32 %v148_v2, %v202_v22 }
 0x152   : > { %vm207_vm5 = vcmp.lt.f32.partialorder %v204_v25, 0.5 }
 0x153   : > { %vm209_vm6 = vcmp.lt.f32.partialorder %v206_v24, 0.5  ;;  %v197_v27 = vpop.permute.xlu0 %196  ;;  %v210_v28 = vsel %vm207_vm5, 0.0, %v204_v25 }
 0x154   : > { %v212_v30 = vsel %vm209_vm6, 0.0, %v206_v24  ;;  %v205_v31 = vsub.f32 %v147_v1, %v197_v27  ;;  %v232_v32 = vsel %vm231_vm4, %v210_v28, 0.0  ;;  %v216_v33 = vrot.slane %v210_v28, %v883_v26  ;;  %v355_v28 = vld [vmem:[#allocation5] sm:$0x7] }
 0x155   : > { %v224_v34 = vrot.slane %v212_v30, %v883_v26  ;;  %233 = vadd.xlane.f32.xlu1 %v232_v32  ;;  %v238_v44 = vsel %vm231_vm4, %v212_v30, 0.0 }
 0x156   : > { %v225_v35 = vmul.f32 %v216_v33, %v204_v25  ;;  %vm208_vm7 = vcmp.lt.f32.partialorder %v205_v31, 0.5  ;;  %v357_v33 = vld [vmem:[#allocation5 + $0x8] sm:$0x7] }
 0x157   : > { %v227_v36 = vmul.f32 %v224_v34, %v206_v24  ;;  %v211_v37 = vsel %vm208_vm7, 0.0, %v205_v31 }
 0x158   : > { %v235_v38 = vsel %vm231_vm4, %v211_v37, 0.0  ;;  %v220_v39 = vrot.slane %v211_v37, %v883_v26  ;;  %v285_v40 = vrot.slane %v225_v35, %v284_v29  ;;  %v334_v51 = vrot.slane %v225_v35, %v333_v46  ;;  %v267_v37 = vld [vmem:[#allocation4 + $0x8] sm:$0xff] }
 0x159   : > { %v293_v41 = vrot.slane %v227_v36, %v284_v29  ;;  %236 = vadd.xlane.f32.xlu0 %v235_v38  ;;  %v310_v55 = vrot.slane %v225_v35, %v309_v45  ;;  %v342_v56 = vrot.slane %v227_v36, %v333_v46  ;;  %v318_v57 = vrot.slane %v227_v36, %v309_v45 }
 0x15a   : > { %v226_v42 = vmul.f32 %v220_v39, %v205_v31  ;;  %v294_v43 = vmul.f32 %v285_v40, %v204_v25  ;;  %v343_v60 = vmul.f32 %v334_v51, %v204_v25  ;;  %v356_v39 = vld [vmem:[#allocation5 + $0x4] sm:$0x7] }
 0x15b   : > { %v296_v48 = vmul.f32 %v293_v41, %v206_v24  ;;  %v319_v61 = vmul.f32 %v310_v55, %v204_v25  ;;  %v345_v62 = vmul.f32 %v342_v56, %v206_v24  ;;  %v321_v1 = vmul.f32 %v318_v57, %v206_v24  ;;  %v377_v55 = vld [vmem:[#allocation2 + $0x8] sm:$0xff] (!%p558_p7)  ;;  %v376_v56 = vld [vmem:[#allocation2] sm:$0xff] (!%p558_p7) }
 0x15c   : > { %v298_v47 = vsel %vm297_vm8, %v294_v43, 0.0  ;;  %v314_v49 = vrot.slane %v226_v42, %v309_v45  ;;  %v289_v50 = vrot.slane %v226_v42, %v284_v29  ;;  %v346_v63 = vsel %vm297_vm8, %v343_v60, 0.0 }
 0x15d   : > { %299 = vadd.xlane.f32.xlu1 %v298_v47  ;;  %239 = vadd.xlane.f32.xlu0 %v238_v44  ;;  %v304_v52 = vsel %vm297_vm8, %v296_v48, 0.0  ;;  %v322_v0 = vsel %vm297_vm8, %v319_v61, 0.0  ;;  %v338_v2 = vrot.slane %v226_v42, %v333_v46  ;;  %v352_v3 = vsel %vm297_vm8, %v345_v62, 0.0  ;;  %v268_v46 = vld [vmem:[#allocation4 + $0x10] sm:$0xff] }
 0x15e   : > { %v320_v53 = vmul.f32 %v314_v49, %v205_v31  ;;  %v295_v54 = vmul.f32 %v289_v50, %v205_v31  ;;  %v328_v4 = vsel %vm297_vm8, %v321_v1, 0.0  ;;  %v428_v57 = vrot.slane (!%p558_p7), %v376_v56, 3 }
 0x15f   : > { %v344_v5 = vmul.f32 %v338_v2, %v205_v31 }
 0x160   : > { %v325_v58 = vsel %vm297_vm8, %v320_v53, 0.0  ;;  %v301_v59 = vsel %vm297_vm8, %v295_v54, 0.0 }
 0x161   : > { %305 = vadd.xlane.f32.xlu1 %v304_v52  ;;  %269 = vadd.xlane.f32.xlu0 %v225_v35  ;;  %v349_v6 = vsel %vm297_vm8, %v344_v5, 0.0 }
 0x165   : > { %326 = vadd.xlane.f32.xlu1 %v325_v58  ;;  %302 = vadd.xlane.f32.xlu0 %v301_v59  ;;  %v378_v58 = vld [vmem:[#allocation2 + $0x10] sm:$0xff] (!%p558_p7)  ;;  %v429_v59 = vrot.slane (!%p558_p7), %v377_v55, 3 }
 0x166   : > { %v430_v60 = vrot.slane (!%p558_p7), %v378_v58, 3 }
 0x169   : > { %347 = vadd.xlane.f32.xlu1 %v346_v63  ;;  %323 = vadd.xlane.f32.xlu0 %v322_v0 }
 0x16d   : > { %353 = vadd.xlane.f32.xlu1 %v352_v3  ;;  %329 = vadd.xlane.f32.xlu0 %v328_v4 }
 0x171   : > { %271 = vadd.xlane.f32.xlu1 %v226_v42  ;;  %350 = vadd.xlane.f32.xlu0 %v349_v6 }
 0x175   : > { %273 = vadd.xlane.f32.xlu0 %v227_v36 }
 0x1e2   : > { %v234_v8 = vpop.xlane.xlu1 %233 }
 0x1e3   : > { %v247_v9 = vrot.slane %v234_v8, %v883_v26 }
 0x1e5   : > { %v259_v10 = vadd.f32 %v247_v9, %v228_v7 }
 0x1e6   : > { %v237_v12 = vpop.xlane.xlu0 %236 }
 0x1e7   : > { %263 = vst.msk [vmem:[#allocation3] sm:$0x1] %vm262_vm9, %v259_v10  ;;  %v251_v13 = vrot.slane %v237_v12, %v883_v26 }
 0x1e9   : > { %v260_v14 = vadd.f32 %v251_v13, %v229_v11 }
 0x1ea   : > { %v300_v15 = vpop.xlane.xlu1 %299  ;;  %v240_v17 = vpop.xlane.xlu0 %239 }
 0x1eb   : > { %264 = vst.msk [vmem:[#allocation3 + $0x1] sm:$0x1] %vm262_vm9, %v260_v14  ;;  %v255_v18 = vrot.slane %v240_v17, %v883_v26 }
 0x1ed   : > { %v261_v20 = vadd.f32 %v255_v18, %v230_v16 }
 0x1ee   : > { %v306_v21 = vpop.xlane.xlu1 %305  ;;  %v270_v22 = vpop.xlane.xlu0 %269  ;;  %v382_v61 = vld [vmem:[#allocation3] sm:$0x1] (!%p558_p7) }
 0x1ef   : > { %265 = vst.msk [vmem:[#allocation3 + $0x2] sm:$0x1] %vm262_vm9, %v261_v20  ;;  %v275_v23 = vadd.f32 %v270_v22, %v266_v19  ;;  %v386_v63 = vsel (!%p558_p7), %vm385_vm13, %v382_v61, 0.0 }
 0x1f1   : > { %279 = vst.msk [vmem:[#allocation4] sm:$0xff] %vm278_vm10, %v275_v23 }
 0x1f2   : > { %v327_v24 = vpop.xlane.xlu1 %326  ;;  %v303_v25 = vpop.xlane.xlu0 %302  ;;  %v383_v62 = vld [vmem:[#allocation3 + $0x1] sm:$0x1] (!%p558_p7) }
 0x1f3   : > { %v359_v40 = vsel %vm278_vm10, %v303_v25, %v327_v24  ;;  %v387_v0 = vsel (!%p558_p7), %vm385_vm13, %v383_v62, 0.0 }
 0x1f6   : > { %v348_v27 = vpop.xlane.xlu1 %347  ;;  %v324_v29 = vpop.xlane.xlu0 %323  ;;  %v384_v1 = vld [vmem:[#allocation3 + $0x2] sm:$0x1] (!%p558_p7) }
 0x1f7   : > { %v358_v30 = vsel %vm278_vm10, %v300_v15, %v324_v29  ;;  %v388_v2 = vsel (!%p558_p7), %vm385_vm13, %v384_v1, 0.0 }
 0x1f8   : > { %v362_v26 = vsel %vm361_vm11, %v358_v30, %v348_v27  ;;  %v379_v50 = vld [vmem:[#allocation4] sm:$0xff] (!%p558_p7) }
 0x1f9   : > { %v365_v31 = vadd.f32 %v362_v26, %v355_v28  ;;  %395 = vrot.lane.b32.xlu0 (!%p558_p7), %v379_v50, %s759_s16  ;;  %v404_v51 = vrot.slane (!%p558_p7), %v379_v50, 3 }
 0x1fa   : > { %v354_v32 = vpop.xlane.xlu1 %353  ;;  %v330_v34 = vpop.xlane.xlu0 %329 }
 0x1fb   : > { %369 = vst.msk [vmem:[#allocation5] sm:$0x7] %vm368_vm12, %v365_v31  ;;  %v360_v35 = vsel %vm278_vm10, %v306_v21, %v330_v34 }
 0x1fc   : > { %v364_v36 = vsel %vm361_vm11, %v360_v35, %v354_v32 }
 0x1fd   : > { %v367_v38 = vadd.f32 %v364_v36, %v357_v33 }
 0x1fe   : > { %v272_v41 = vpop.xlane.xlu1 %271  ;;  %v351_v42 = vpop.xlane.xlu0 %350 }
 0x1ff   : > { %371 = vst.msk [vmem:[#allocation5 + $0x8] sm:$0x7] %vm368_vm12, %v367_v38  ;;  %v276_v43 = vadd.f32 %v272_v41, %v267_v37  ;;  %v363_v44 = vsel %vm361_vm11, %v359_v40, %v351_v42  ;;  %375 = sbr.rel (%p558_p7) target bundleno = 666 (0x29a), region = 36 }
 0x200   : > { %v366_v45 = vadd.f32 %v363_v44, %v356_v39 }
 0x201   : > { %280 = vst.msk [vmem:[#allocation4 + $0x8] sm:$0xff] %vm278_vm10, %v276_v43 }
 0x202   : > { %370 = vst.msk [vmem:[#allocation5 + $0x4] sm:$0x7] %vm368_vm12, %v366_v45  ;;  %v274_v47 = vpop.xlane.xlu0 %273  ;;  %v389_v13 = vld [vmem:[#allocation5] sm:$0x7] (!%p558_p7) }
 0x203   : > { %v277_v48 = vadd.f32 %v274_v47, %v268_v46 }
 0x205   : > { %281 = vst.msk [vmem:[#allocation4 + $0x10] sm:$0xff] %vm278_vm10, %v277_v48 }
 0x206   : > { %v391_v19 = vld [vmem:[#allocation5 + $0x8] sm:$0x7] }
 0x208   : > { %v380_v52 = vld [vmem:[#allocation4 + $0x8] sm:$0xff] }
 0x209   : > { %v405_v54 = vrot.slane %v380_v52, 3  ;;  %397 = vrot.lane.b32.xlu0 %v380_v52, %s759_s16  ;;  %v390_v14 = vld [vmem:[#allocation5 + $0x4] sm:$0x7] }
 0x20c   : > { %v381_v49 = vld [vmem:[#allocation4 + $0x10] sm:$0xff] }
 0x20d   : > { %399 = vrot.lane.b32.xlu1 %v381_v49, %s759_s16  ;;  %v406_v53 = vrot.slane %v381_v49, 3  ;;  %409 = vrot.lane.b32.xlu0 %v405_v54, %s760_s23 }
 0x211   : > { %407 = vrot.lane.b32.xlu1 %v404_v51, %s760_s23  ;;  %419 = vrot.lane.b32.xlu0 %v376_v56, %s761_s24 }
 0x215   : > { %411 = vrot.lane.b32.xlu1 %v406_v53, %s760_s23  ;;  %423 = vrot.lane.b32.xlu0 %v378_v58, %s761_s24 }
 0x219   : > { %421 = vrot.lane.b32.xlu1 %v377_v55, %s761_s24  ;;  %433 = vrot.lane.b32.xlu0 %v429_v59, %s762_s9 }
 0x21d   : > { %431 = vrot.lane.b32.xlu1 %v428_v57, %s762_s9  ;;  %443 = vrot.lane.b32.xlu0 %v386_v63, %s763_s26 }
 0x221   : > { %435 = vrot.lane.b32.xlu1 %v430_v60, %s762_s9  ;;  %447 = vrot.lane.b32.xlu0 %v388_v2, %s763_s26 }
 0x225   : > { %445 = vrot.lane.b32.xlu1 %v387_v0, %s763_s26 }
 0x26b   : > { %v396_v4 = vpop.permute.xlu0 %395 }
 0x26c   : > { %v453_v17 = vsel %vm452_vm14, %v389_v13, %v396_v4 }
 0x27b   : > { %v398_v5 = vpop.permute.xlu0 %397 }
 0x27c   : > { %v454_v18 = vsel %vm452_vm14, %v390_v14, %v398_v5 }
 0x27f   : > { %v400_v3 = vpop.permute.xlu1 %399  ;;  %v410_v7 = vpop.permute.xlu0 %409 }
 0x280   : > { %v458_v21 = vsel %vm456_vm15, %v454_v18, %v410_v7  ;;  %v455_v29 = vsel %vm452_vm14, %v391_v19, %v400_v3 }
 0x283   : > { %v408_v6 = vpop.permute.xlu1 %407  ;;  %v420_v10 = vpop.permute.xlu0 %419 }
 0x284   : > { %v457_v20 = vsel %vm456_vm15, %v453_v17, %v408_v6 }
 0x285   : > { %v461_v23 = vsel %vm460_vm0, %v457_v20, %v420_v10 }
 0x287   : > { %v412_v8 = vpop.permute.xlu1 %411  ;;  %v424_v11 = vpop.permute.xlu0 %423 }
 0x288   : > { %v459_v31 = vsel %vm456_vm15, %v455_v29, %v412_v8 }
 0x289   : > { %v463_v32 = vsel %vm460_vm0, %v459_v31, %v424_v11 }
 0x28b   : > { %v422_v9 = vpop.permute.xlu1 %421  ;;  %v434_v15 = vpop.permute.xlu0 %433 }
 0x28c   : > { %v462_v22 = vsel %vm460_vm0, %v458_v21, %v422_v9 }
 0x28d   : > { %v466_v25 = vsel %vm464_vm1, %v462_v22, %v434_v15 }
 0x28f   : > { %v432_v12 = vpop.permute.xlu1 %431  ;;  %v444_v27 = vpop.permute.xlu0 %443 }
 0x290   : > { %v465_v24 = vsel %vm464_vm1, %v461_v23, %v432_v12 }
 0x291   : > { %v469_v30 = vsel %vm468_vm2, %v465_v24, %v444_v27 }
 0x292   : > { %473 = vst.msk [vmem:[#allocation9] sm:$0x7] %vm472_vm3, %v469_v30 }
 0x293   : > { %v436_v16 = vpop.permute.xlu1 %435  ;;  %v448_v34 = vpop.permute.xlu0 %447 }
 0x294   : > { %v467_v33 = vsel %vm464_vm1, %v463_v32, %v436_v16 }
 0x295   : > { %v471_v35 = vsel %vm468_vm2, %v467_v33, %v448_v34 }
 0x296   : > { %475 = vst.msk [vmem:[#allocation9 + $0x8] sm:$0x7] %vm472_vm3, %v471_v35 }
 0x297   : > { %v446_v28 = vpop.permute.xlu1 %445 }
 0x298   : > { %v470_v26 = vsel %vm468_vm2, %v466_v25, %v446_v28 }
 0x299   : > { %474 = vst.msk [vmem:[#allocation9 + $0x4] sm:$0x7] %vm472_vm3, %v470_v26 }
 0x29a PF: > { %p936_p10 = scmp.eq.s32.totalorder %s551_s12, 2  ;;  %s764_s29 = smov [#allocation9]  }
 0x29b   : > { %s485_s30 = sshll.u32 %s764_s29, 4  ;;  %s486_s30 = int_to_ptr.vmem [resolvable:$true] %s485_s30 }
 0x29c   : > { %s671_s2 = scalar_lea.vmem %s486_s30, 192  ;;  %p678_p11 = scmp.lt.s32.totalorder %s486_s30, %s486_s30 }
 0x29d   : > { %p672_p5 = scmp.ne.s32.totalorder %s486_s30, %s671_s2  ;;  %p679_p13 = scmp.lt.s32.totalorder %s671_s2, %s671_s2 }
 0x29f   : > { %p673_p6 = pnand %p672_p5, %p936_p10  ;;  %p680_p1 = por %p679_p13, %p678_p11 }
 0x2a1   : > { %p674_p8 = pneg %p673_p6 }
 0x2a3   : > { %p681_p2 = pnand %p680_p1, %p674_p8 }
 0x2a5   : > { %684 = shalt.err (!%p681_p2)
}
 0x2a6   : > { %s685_s12 = scalar_lea.hbm %s981_s1, 192 }
 0x2a7   : > { %p686_p3 = scmp.ne.s32.totalorder %s981_s1, %s685_s12  ;;  %p691_p4 = scmp.lt.u32.totalorder %s685_s12, %s981_s1 }
 0x2a9   : > { %p687_p12 = pnand %p686_p3, %p936_p10 }
 0x2ab   : > { %p688_p0 = pneg %p687_p12 }
 0x2ad   : > { %p693_p9 = pnand %p691_p4, %p688_p0 }
 0x2af   : > { %696 = shalt.err (!%p693_p9)
}
 0x2b0   : > { %s765_s18 = smov 64   ;;  %s766_s19 = smov 4  }
 0x2b1   : > { %568 = dma.vmem_to_hbm [thread:$0]  (%p936_p10), %s486_s30, 192, %s981_s1, [#allocation8], %s765_s18, %s765_s18, %s766_s19  }
 0x2b2   : > { %726 = dma.done.wait (%p936_p10), [#allocation8], 192  }
 0x2b3   : > { %728 = vsyncadd (%p936_p10), [#allocation8], 4294967104 }
 0x2b4 PF: > { %s15_s11 = sadd.s32 1, %s751_s11   ;;  %s986_s6 = smov %s735_s7 }
 0x2b5   : > { %p12_p7 = scmp.ge.s32.totalorder %s15_s11, 5   ;;  %s987_s7 = smov %s739_s8 }
 0x2b6   : > { %s988_s8 = smov %s824_s17  ;;  %s989_s9 = smov %s747_s10 }
 0x2b7   : > { %s990_s10 = smov %s992_s13  ;;  %14 = sbr.rel (!%p12_p7) target bundleno = 5 (0x5), region = 70 }
 0x2be   :  { %501 = vsyncpa [#allocation7], 1 }
 0x2bf   :  { %503 = vsyncpa [#allocation7 + $0x1], 1 }
 0x2c0   :  { %504 = vsyncpa [#allocation8], 1 }
 0x2c1   :  { %506 = vsyncpa [#allocation8 + $0x1], 1 }

</bundles_post_ra>
